<compile_context>
chip_gen: v7x
topology: tpu7x:2x2x1
jax: 0.10.0
libtpu: 0.0.40
codegen_flags: <defaults>
</compile_context>

<pallas_src>
import functools

import jax
import jax.numpy as jnp
from jax.experimental import pallas as pl
from jax.experimental.pallas import tpu as pltpu

EPS = 1e-5
LANES = 128

# Row layout of the packed parameter slab (single (rows, 128) f32 VMEM operand):
#   row 0: g1   row 1: b1   row 2: fb1
#   row 3: g2   row 4: b2   row 5: fb2
#   row 6: g3   row 7: b3
#   rows 8              .. 8+e1_dim-1        : w1 rows (stored (in, out))
#   rows 8+e1_dim       .. 8+e1_dim+hidden-1 : w2 rows (stored (in, out))
_N_VEC_ROWS = 8


def _predictor_kernel(x_ref, p_ref, o_ref, *, batch, e1_dim, hidden):
    inv_b = 1.0 / batch

    def bn(v, gamma, beta):
        # Training-mode BatchNorm1d, single-pass stats over the batch axis:
        # var = E[v^2] - mean^2 (biased), scale = gamma / sqrt(var + eps).
        mean = jnp.sum(v, axis=0, keepdims=True) * inv_b
        ex2 = jnp.sum(v * v, axis=0, keepdims=True) * inv_b
        var = ex2 - mean * mean
        scale = gamma * jax.lax.rsqrt(var + EPS)     # rsqrt rides the EUP slot
        shift = beta - mean * scale
        return v * scale + shift                     # one mul + one add per element

    x = x_ref[...]                                   # (B, 128); lanes >= e1_dim are zero

    g1, b1, fb1 = p_ref[0:1, :], p_ref[1:2, :], p_ref[2:3, :]
    g2, b2, fb2 = p_ref[3:4, :], p_ref[4:5, :], p_ref[5:6, :]
    g3, b3 = p_ref[6:7, :], p_ref[7:8, :]

    # x = bn1(x)   (padded lanes stay exactly 0: gamma/beta are zero-padded)
    h = bn(x, g1, b1)

    # x = relu(bn2(fc1(x)))
    # K=10 contraction on the VPU: unrolled broadcast multiply-accumulate over
    # one (B,128) vreg — no MXU tile padding / result-FIFO latency.
    acc = jnp.broadcast_to(fb1, h.shape)             # hoisted broadcast (not in loop)
    w1_row0 = _N_VEC_ROWS
    for k in range(e1_dim):                          # static unroll, K = 10
        acc = acc + h[:, k:k + 1] * p_ref[w1_row0 + k:w1_row0 + k + 1, :]
    h = jnp.maximum(bn(acc, g2, b2), 0.0)

    # x = relu(bn3(fc2(x)))
    acc = jnp.broadcast_to(fb2, h.shape)
    w2_row0 = _N_VEC_ROWS + e1_dim
    for k in range(hidden):                          # static unroll, K = 10
        acc = acc + h[:, k:k + 1] * p_ref[w2_row0 + k:w2_row0 + k + 1, :]
    y = jnp.maximum(bn(acc, g3, b3), 0.0)

    # Lane-dense unmasked store of the full 128-wide slab.
    o_ref[...] = y.astype(o_ref.dtype)


def pack_params(p):
    """Pack all PredictorGerman parameters into one (rows, 128) f32 VMEM slab."""
    e1_dim, hidden = p["w1"].shape
    num_classes = p["w2"].shape[1]
    rows = _N_VEC_ROWS + e1_dim + hidden
    rows_pad = ((rows + 7) // 8) * 8
    slab = jnp.zeros((rows_pad, LANES), jnp.float32)

    def put(s, row, v):
        v = jnp.asarray(v, jnp.float32).reshape(-1)
        return s.at[row, : v.shape[0]].set(v)

    slab = put(slab, 0, p["g1"])
    slab = put(slab, 1, p["b1"])
    slab = put(slab, 2, p["fb1"])
    slab = put(slab, 3, p["g2"])
    slab = put(slab, 4, p["b2"])
    slab = put(slab, 5, p["fb2"])
    slab = put(slab, 6, p["g3"])
    slab = put(slab, 7, p["b3"])
    slab = slab.at[_N_VEC_ROWS:_N_VEC_ROWS + e1_dim, :hidden].set(p["w1"])
    slab = slab.at[_N_VEC_ROWS + e1_dim:_N_VEC_ROWS + e1_dim + hidden,
                   :num_classes].set(p["w2"])
    return slab


def predictor_german(x, param_slab, *, e1_dim=10, hidden=10, num_classes=2):
    """x: (B, e1_dim) float32. param_slab: output of pack_params()."""
    B = x.shape[0]
    assert x.shape[1] == e1_dim

    # Lane-dense input slab: features in lanes [0, e1_dim), zeros elsewhere.
    x_pad = jnp.zeros((B, LANES), jnp.float32).at[:, :e1_dim].set(
        x.astype(jnp.float32))

    vmem = pl.BlockSpec(memory_space=pltpu.MemorySpace.VMEM)
    kernel = functools.partial(
        _predictor_kernel, batch=B, e1_dim=e1_dim, hidden=hidden)

    out = pl.pallas_call(
        kernel,
        out_shape=jax.ShapeDtypeStruct((B, LANES), jnp.float32),
        in_specs=[vmem, vmem],
        out_specs=vmem,
    )(x_pad, param_slab)

    # Valid logits live in lanes [0, num_classes).
    return out[:, :num_classes]


def init_params(key, e1_dim=10, hidden=10, num_classes=2):
    """Deterministic synthetic parameters matching PredictorGerman.__init__ shapes."""
    ks = jax.random.split(key, 10)
    f32 = jnp.float32

    def uni(k, shape, bound):
        return jax.random.uniform(k, shape, f32, -bound, bound)

    g1 = 1.0 + 0.1 * jax.random.normal(ks[0], (1, e1_dim), f32)
    b1 = 0.1 * jax.random.normal(ks[1], (1, e1_dim), f32)
    g2 = 1.0 + 0.1 * jax.random.normal(ks[2], (1, hidden), f32)
    b2 = 0.1 * jax.random.normal(ks[3], (1, hidden), f32)
    g3 = 1.0 + 0.1 * jax.random.normal(ks[4], (1, num_classes), f32)
    b3 = 0.1 * jax.random.normal(ks[5], (1, num_classes), f32)

    # Linear layers, PyTorch-style U(-1/sqrt(fan_in), 1/sqrt(fan_in)),
    # stored pre-transposed as (in, out) so the kernel does x @ W row-wise.
    bound1 = 1.0 / (e1_dim ** 0.5)
    w1 = uni(ks[6], (e1_dim, hidden), bound1)
    fb1 = uni(ks[7], (1, hidden), bound1)
    bound2 = 1.0 / (hidden ** 0.5)
    w2 = uni(ks[8], (hidden, num_classes), bound2)
    fb2 = uni(ks[9], (1, num_classes), bound2)

    return {
        "g1": g1, "b1": b1, "w1": w1, "fb1": fb1,
        "g2": g2, "b2": b2, "w2": w2, "fb2": fb2,
        "g3": g3, "b3": b3,
    }


def reference_forward(x, p):
    """Pure-JAX reference for sanity checking (two-pass BN, identical math)."""
    def bn(v, g, b):
        m = jnp.mean(v, axis=0, keepdims=True)
        var = jnp.mean((v - m) ** 2, axis=0, keepdims=True)
        return (v - m) / jnp.sqrt(var + EPS) * g + b

    h = bn(x, p["g1"], p["b1"])
    h = jnp.maximum(bn(h @ p["w1"] + p["fb1"], p["g2"], p["b2"]), 0.0)
    h = jnp.maximum(bn(h @ p["w2"] + p["fb2"], p["g3"], p["b3"]), 0.0)
    return h


# TODO(synk): training-mode BatchNorm1d also updates running_mean/running_var
# in place; that side effect (not part of the functional forward) is omitted.

if __name__ == "__main__":
    key = jax.random.PRNGKey(0)
    k_x, k_p = jax.random.split(key)

    B, E1_DIM, HIDDEN, NUM_CLASSES = 8, 10, 10, 2
    x = jax.random.normal(k_x, (B, E1_DIM), jnp.float32)
    params = init_params(k_p, e1_dim=E1_DIM, hidden=HIDDEN,
                         num_classes=NUM_CLASSES)
    slab = pack_params(params)   # built once; reused across calls

    out = predictor_german(x, slab, e1_dim=E1_DIM, hidden=HIDDEN,
                           num_classes=NUM_CLASSES)
    out = jax.block_until_ready(out)

    ref = reference_forward(x, params)
    assert out.shape == (B, NUM_CLASSES)
    assert jnp.allclose(out, ref, atol=1e-4, rtol=1e-4)

    print("KERNEL_OK")
</pallas_src>

<mosaic_0001>
module attributes {stable_mosaic.version = 11 : i64} {
  func.func @_predictor_kernel(%arg0: memref<8x128xf32, #tpu.memory_space<vmem>>, %arg1: memref<32x128xf32, #tpu.memory_space<vmem>>, %arg2: memref<8x128xf32, #tpu.memory_space<vmem>>) attributes {dimension_semantics = [], scalar_prefetch = 0 : i64, scratch_operands = 0 : i64, tpu.core_type = #tpu.core_type<tc>} {
    %c0 = arith.constant 0 : index
    %c0_0 = arith.constant 0 : index
    %0 = vector.load %arg0[%c0, %c0_0] : memref<8x128xf32, #tpu.memory_space<vmem>>, vector<8x128xf32>
    %c0_1 = arith.constant 0 : index
    %c0_2 = arith.constant 0 : index
    %1 = vector.load %arg1[%c0_1, %c0_2] : memref<32x128xf32, #tpu.memory_space<vmem>>, vector<1x128xf32>
    %c1 = arith.constant 1 : index
    %c0_3 = arith.constant 0 : index
    %2 = vector.load %arg1[%c1, %c0_3] : memref<32x128xf32, #tpu.memory_space<vmem>>, vector<1x128xf32>
    %c2 = arith.constant 2 : index
    %c0_4 = arith.constant 0 : index
    %3 = vector.load %arg1[%c2, %c0_4] : memref<32x128xf32, #tpu.memory_space<vmem>>, vector<1x128xf32>
    %c3 = arith.constant 3 : index
    %c0_5 = arith.constant 0 : index
    %4 = vector.load %arg1[%c3, %c0_5] : memref<32x128xf32, #tpu.memory_space<vmem>>, vector<1x128xf32>
    %c4 = arith.constant 4 : index
    %c0_6 = arith.constant 0 : index
    %5 = vector.load %arg1[%c4, %c0_6] : memref<32x128xf32, #tpu.memory_space<vmem>>, vector<1x128xf32>
    %c5 = arith.constant 5 : index
    %c0_7 = arith.constant 0 : index
    %6 = vector.load %arg1[%c5, %c0_7] : memref<32x128xf32, #tpu.memory_space<vmem>>, vector<1x128xf32>
    %c6 = arith.constant 6 : index
    %c0_8 = arith.constant 0 : index
    %7 = vector.load %arg1[%c6, %c0_8] : memref<32x128xf32, #tpu.memory_space<vmem>>, vector<1x128xf32>
    %c7 = arith.constant 7 : index
    %c0_9 = arith.constant 0 : index
    %8 = vector.load %arg1[%c7, %c0_9] : memref<32x128xf32, #tpu.memory_space<vmem>>, vector<1x128xf32>
    %cst = arith.constant dense<0.000000e+00> : vector<128xf32>
    %9 = vector.multi_reduction <add>, %0, %cst [0] : vector<8x128xf32> to vector<128xf32>
    %10 = vector.shape_cast %9 : vector<128xf32> to vector<1x128xf32>
    %cst_10 = arith.constant 1.250000e-01 : f32
    %11 = vector.broadcast %cst_10 : f32 to vector<1x128xf32>
    %12 = arith.mulf %10, %11 : vector<1x128xf32>
    %13 = arith.mulf %0, %0 : vector<8x128xf32>
    %cst_11 = arith.constant dense<0.000000e+00> : vector<128xf32>
    %14 = vector.multi_reduction <add>, %13, %cst_11 [0] : vector<8x128xf32> to vector<128xf32>
    %15 = vector.shape_cast %14 : vector<128xf32> to vector<1x128xf32>
    %cst_12 = arith.constant 1.250000e-01 : f32
    %16 = vector.broadcast %cst_12 : f32 to vector<1x128xf32>
    %17 = arith.mulf %15, %16 : vector<1x128xf32>
    %18 = arith.mulf %12, %12 : vector<1x128xf32>
    %19 = arith.subf %17, %18 : vector<1x128xf32>
    %cst_13 = arith.constant 9.99999974E-6 : f32
    %20 = vector.broadcast %cst_13 : f32 to vector<1x128xf32>
    %21 = arith.addf %19, %20 : vector<1x128xf32>
    %22 = math.rsqrt %21 : vector<1x128xf32>
    %23 = arith.mulf %1, %22 : vector<1x128xf32>
    %24 = arith.mulf %12, %23 : vector<1x128xf32>
    %25 = arith.subf %2, %24 : vector<1x128xf32>
    %26 = vector.broadcast %23 : vector<1x128xf32> to vector<8x128xf32>
    %27 = arith.mulf %0, %26 : vector<8x128xf32>
    %28 = vector.broadcast %25 : vector<1x128xf32> to vector<8x128xf32>
    %29 = arith.addf %27, %28 : vector<8x128xf32>
    %30 = vector.shape_cast %3 : vector<1x128xf32> to vector<1x128xf32>
    %31 = vector.broadcast %30 : vector<1x128xf32> to vector<8x128xf32>
    %32 = vector.extract_strided_slice %29 {offsets = [0, 0], sizes = [8, 1], strides = [1, 1]} : vector<8x128xf32> to vector<8x1xf32>
    %c8 = arith.constant 8 : index
    %c0_14 = arith.constant 0 : index
    %33 = vector.load %arg1[%c8, %c0_14] : memref<32x128xf32, #tpu.memory_space<vmem>>, vector<1x128xf32>
    %34 = vector.broadcast %32 : vector<8x1xf32> to vector<8x128xf32>
    %35 = vector.broadcast %33 : vector<1x128xf32> to vector<8x128xf32>
    %36 = arith.mulf %34, %35 : vector<8x128xf32>
    %37 = arith.addf %31, %36 : vector<8x128xf32>
    %38 = vector.extract_strided_slice %29 {offsets = [0, 1], sizes = [8, 1], strides = [1, 1]} : vector<8x128xf32> to vector<8x1xf32>
    %c9 = arith.constant 9 : index
    %c0_15 = arith.constant 0 : index
    %39 = vector.load %arg1[%c9, %c0_15] : memref<32x128xf32, #tpu.memory_space<vmem>>, vector<1x128xf32>
    %40 = vector.broadcast %38 : vector<8x1xf32> to vector<8x128xf32>
    %41 = vector.broadcast %39 : vector<1x128xf32> to vector<8x128xf32>
    %42 = arith.mulf %40, %41 : vector<8x128xf32>
    %43 = arith.addf %37, %42 : vector<8x128xf32>
    %44 = vector.extract_strided_slice %29 {offsets = [0, 2], sizes = [8, 1], strides = [1, 1]} : vector<8x128xf32> to vector<8x1xf32>
    %c10 = arith.constant 10 : index
    %c0_16 = arith.constant 0 : index
    %45 = vector.load %arg1[%c10, %c0_16] : memref<32x128xf32, #tpu.memory_space<vmem>>, vector<1x128xf32>
    %46 = vector.broadcast %44 : vector<8x1xf32> to vector<8x128xf32>
    %47 = vector.broadcast %45 : vector<1x128xf32> to vector<8x128xf32>
    %48 = arith.mulf %46, %47 : vector<8x128xf32>
    %49 = arith.addf %43, %48 : vector<8x128xf32>
    %50 = vector.extract_strided_slice %29 {offsets = [0, 3], sizes = [8, 1], strides = [1, 1]} : vector<8x128xf32> to vector<8x1xf32>
    %c11 = arith.constant 11 : index
    %c0_17 = arith.constant 0 : index
    %51 = vector.load %arg1[%c11, %c0_17] : memref<32x128xf32, #tpu.memory_space<vmem>>, vector<1x128xf32>
    %52 = vector.broadcast %50 : vector<8x1xf32> to vector<8x128xf32>
    %53 = vector.broadcast %51 : vector<1x128xf32> to vector<8x128xf32>
    %54 = arith.mulf %52, %53 : vector<8x128xf32>
    %55 = arith.addf %49, %54 : vector<8x128xf32>
    %56 = vector.extract_strided_slice %29 {offsets = [0, 4], sizes = [8, 1], strides = [1, 1]} : vector<8x128xf32> to vector<8x1xf32>
    %c12 = arith.constant 12 : index
    %c0_18 = arith.constant 0 : index
    %57 = vector.load %arg1[%c12, %c0_18] : memref<32x128xf32, #tpu.memory_space<vmem>>, vector<1x128xf32>
    %58 = vector.broadcast %56 : vector<8x1xf32> to vector<8x128xf32>
    %59 = vector.broadcast %57 : vector<1x128xf32> to vector<8x128xf32>
    %60 = arith.mulf %58, %59 : vector<8x128xf32>
    %61 = arith.addf %55, %60 : vector<8x128xf32>
    %62 = vector.extract_strided_slice %29 {offsets = [0, 5], sizes = [8, 1], strides = [1, 1]} : vector<8x128xf32> to vector<8x1xf32>
    %c13 = arith.constant 13 : index
    %c0_19 = arith.constant 0 : index
    %63 = vector.load %arg1[%c13, %c0_19] : memref<32x128xf32, #tpu.memory_space<vmem>>, vector<1x128xf32>
    %64 = vector.broadcast %62 : vector<8x1xf32> to vector<8x128xf32>
    %65 = vector.broadcast %63 : vector<1x128xf32> to vector<8x128xf32>
    %66 = arith.mulf %64, %65 : vector<8x128xf32>
    %67 = arith.addf %61, %66 : vector<8x128xf32>
    %68 = vector.extract_strided_slice %29 {offsets = [0, 6], sizes = [8, 1], strides = [1, 1]} : vector<8x128xf32> to vector<8x1xf32>
    %c14 = arith.constant 14 : index
    %c0_20 = arith.constant 0 : index
    %69 = vector.load %arg1[%c14, %c0_20] : memref<32x128xf32, #tpu.memory_space<vmem>>, vector<1x128xf32>
    %70 = vector.broadcast %68 : vector<8x1xf32> to vector<8x128xf32>
    %71 = vector.broadcast %69 : vector<1x128xf32> to vector<8x128xf32>
    %72 = arith.mulf %70, %71 : vector<8x128xf32>
    %73 = arith.addf %67, %72 : vector<8x128xf32>
    %74 = vector.extract_strided_slice %29 {offsets = [0, 7], sizes = [8, 1], strides = [1, 1]} : vector<8x128xf32> to vector<8x1xf32>
    %c15 = arith.constant 15 : index
    %c0_21 = arith.constant 0 : index
    %75 = vector.load %arg1[%c15, %c0_21] : memref<32x128xf32, #tpu.memory_space<vmem>>, vector<1x128xf32>
    %76 = vector.broadcast %74 : vector<8x1xf32> to vector<8x128xf32>
    %77 = vector.broadcast %75 : vector<1x128xf32> to vector<8x128xf32>
    %78 = arith.mulf %76, %77 : vector<8x128xf32>
    %79 = arith.addf %73, %78 : vector<8x128xf32>
    %80 = vector.extract_strided_slice %29 {offsets = [0, 8], sizes = [8, 1], strides = [1, 1]} : vector<8x128xf32> to vector<8x1xf32>
    %c16 = arith.constant 16 : index
    %c0_22 = arith.constant 0 : index
    %81 = vector.load %arg1[%c16, %c0_22] : memref<32x128xf32, #tpu.memory_space<vmem>>, vector<1x128xf32>
    %82 = vector.broadcast %80 : vector<8x1xf32> to vector<8x128xf32>
    %83 = vector.broadcast %81 : vector<1x128xf32> to vector<8x128xf32>
    %84 = arith.mulf %82, %83 : vector<8x128xf32>
    %85 = arith.addf %79, %84 : vector<8x128xf32>
    %86 = vector.extract_strided_slice %29 {offsets = [0, 9], sizes = [8, 1], strides = [1, 1]} : vector<8x128xf32> to vector<8x1xf32>
    %c17 = arith.constant 17 : index
    %c0_23 = arith.constant 0 : index
    %87 = vector.load %arg1[%c17, %c0_23] : memref<32x128xf32, #tpu.memory_space<vmem>>, vector<1x128xf32>
    %88 = vector.broadcast %86 : vector<8x1xf32> to vector<8x128xf32>
    %89 = vector.broadcast %87 : vector<1x128xf32> to vector<8x128xf32>
    %90 = arith.mulf %88, %89 : vector<8x128xf32>
    %91 = arith.addf %85, %90 : vector<8x128xf32>
    %cst_24 = arith.constant dense<0.000000e+00> : vector<128xf32>
    %92 = vector.multi_reduction <add>, %91, %cst_24 [0] : vector<8x128xf32> to vector<128xf32>
    %93 = vector.shape_cast %92 : vector<128xf32> to vector<1x128xf32>
    %cst_25 = arith.constant 1.250000e-01 : f32
    %94 = vector.broadcast %cst_25 : f32 to vector<1x128xf32>
    %95 = arith.mulf %93, %94 : vector<1x128xf32>
    %96 = arith.mulf %91, %91 : vector<8x128xf32>
    %cst_26 = arith.constant dense<0.000000e+00> : vector<128xf32>
    %97 = vector.multi_reduction <add>, %96, %cst_26 [0] : vector<8x128xf32> to vector<128xf32>
    %98 = vector.shape_cast %97 : vector<128xf32> to vector<1x128xf32>
    %cst_27 = arith.constant 1.250000e-01 : f32
    %99 = vector.broadcast %cst_27 : f32 to vector<1x128xf32>
    %100 = arith.mulf %98, %99 : vector<1x128xf32>
    %101 = arith.mulf %95, %95 : vector<1x128xf32>
    %102 = arith.subf %100, %101 : vector<1x128xf32>
    %cst_28 = arith.constant 9.99999974E-6 : f32
    %103 = vector.broadcast %cst_28 : f32 to vector<1x128xf32>
    %104 = arith.addf %102, %103 : vector<1x128xf32>
    %105 = math.rsqrt %104 : vector<1x128xf32>
    %106 = arith.mulf %4, %105 : vector<1x128xf32>
    %107 = arith.mulf %95, %106 : vector<1x128xf32>
    %108 = arith.subf %5, %107 : vector<1x128xf32>
    %109 = vector.broadcast %106 : vector<1x128xf32> to vector<8x128xf32>
    %110 = arith.mulf %91, %109 : vector<8x128xf32>
    %111 = vector.broadcast %108 : vector<1x128xf32> to vector<8x128xf32>
    %112 = arith.addf %110, %111 : vector<8x128xf32>
    %cst_29 = arith.constant 0.000000e+00 : f32
    %113 = vector.broadcast %cst_29 : f32 to vector<8x128xf32>
    %114 = arith.maximumf %112, %113 : vector<8x128xf32>
    %115 = vector.shape_cast %6 : vector<1x128xf32> to vector<1x128xf32>
    %116 = vector.broadcast %115 : vector<1x128xf32> to vector<8x128xf32>
    %117 = vector.extract_strided_slice %114 {offsets = [0, 0], sizes = [8, 1], strides = [1, 1]} : vector<8x128xf32> to vector<8x1xf32>
    %c18 = arith.constant 18 : index
    %c0_30 = arith.constant 0 : index
    %118 = vector.load %arg1[%c18, %c0_30] : memref<32x128xf32, #tpu.memory_space<vmem>>, vector<1x128xf32>
    %119 = vector.broadcast %117 : vector<8x1xf32> to vector<8x128xf32>
    %120 = vector.broadcast %118 : vector<1x128xf32> to vector<8x128xf32>
    %121 = arith.mulf %119, %120 : vector<8x128xf32>
    %122 = arith.addf %116, %121 : vector<8x128xf32>
    %123 = vector.extract_strided_slice %114 {offsets = [0, 1], sizes = [8, 1], strides = [1, 1]} : vector<8x128xf32> to vector<8x1xf32>
    %c19 = arith.constant 19 : index
    %c0_31 = arith.constant 0 : index
    %124 = vector.load %arg1[%c19, %c0_31] : memref<32x128xf32, #tpu.memory_space<vmem>>, vector<1x128xf32>
    %125 = vector.broadcast %123 : vector<8x1xf32> to vector<8x128xf32>
    %126 = vector.broadcast %124 : vector<1x128xf32> to vector<8x128xf32>
    %127 = arith.mulf %125, %126 : vector<8x128xf32>
    %128 = arith.addf %122, %127 : vector<8x128xf32>
    %129 = vector.extract_strided_slice %114 {offsets = [0, 2], sizes = [8, 1], strides = [1, 1]} : vector<8x128xf32> to vector<8x1xf32>
    %c20 = arith.constant 20 : index
    %c0_32 = arith.constant 0 : index
    %130 = vector.load %arg1[%c20, %c0_32] : memref<32x128xf32, #tpu.memory_space<vmem>>, vector<1x128xf32>
    %131 = vector.broadcast %129 : vector<8x1xf32> to vector<8x128xf32>
    %132 = vector.broadcast %130 : vector<1x128xf32> to vector<8x128xf32>
    %133 = arith.mulf %131, %132 : vector<8x128xf32>
    %134 = arith.addf %128, %133 : vector<8x128xf32>
    %135 = vector.extract_strided_slice %114 {offsets = [0, 3], sizes = [8, 1], strides = [1, 1]} : vector<8x128xf32> to vector<8x1xf32>
    %c21 = arith.constant 21 : index
    %c0_33 = arith.constant 0 : index
    %136 = vector.load %arg1[%c21, %c0_33] : memref<32x128xf32, #tpu.memory_space<vmem>>, vector<1x128xf32>
    %137 = vector.broadcast %135 : vector<8x1xf32> to vector<8x128xf32>
    %138 = vector.broadcast %136 : vector<1x128xf32> to vector<8x128xf32>
    %139 = arith.mulf %137, %138 : vector<8x128xf32>
    %140 = arith.addf %134, %139 : vector<8x128xf32>
    %141 = vector.extract_strided_slice %114 {offsets = [0, 4], sizes = [8, 1], strides = [1, 1]} : vector<8x128xf32> to vector<8x1xf32>
    %c22 = arith.constant 22 : index
    %c0_34 = arith.constant 0 : index
    %142 = vector.load %arg1[%c22, %c0_34] : memref<32x128xf32, #tpu.memory_space<vmem>>, vector<1x128xf32>
    %143 = vector.broadcast %141 : vector<8x1xf32> to vector<8x128xf32>
    %144 = vector.broadcast %142 : vector<1x128xf32> to vector<8x128xf32>
    %145 = arith.mulf %143, %144 : vector<8x128xf32>
    %146 = arith.addf %140, %145 : vector<8x128xf32>
    %147 = vector.extract_strided_slice %114 {offsets = [0, 5], sizes = [8, 1], strides = [1, 1]} : vector<8x128xf32> to vector<8x1xf32>
    %c23 = arith.constant 23 : index
    %c0_35 = arith.constant 0 : index
    %148 = vector.load %arg1[%c23, %c0_35] : memref<32x128xf32, #tpu.memory_space<vmem>>, vector<1x128xf32>
    %149 = vector.broadcast %147 : vector<8x1xf32> to vector<8x128xf32>
    %150 = vector.broadcast %148 : vector<1x128xf32> to vector<8x128xf32>
    %151 = arith.mulf %149, %150 : vector<8x128xf32>
    %152 = arith.addf %146, %151 : vector<8x128xf32>
    %153 = vector.extract_strided_slice %114 {offsets = [0, 6], sizes = [8, 1], strides = [1, 1]} : vector<8x128xf32> to vector<8x1xf32>
    %c24 = arith.constant 24 : index
    %c0_36 = arith.constant 0 : index
    %154 = vector.load %arg1[%c24, %c0_36] : memref<32x128xf32, #tpu.memory_space<vmem>>, vector<1x128xf32>
    %155 = vector.broadcast %153 : vector<8x1xf32> to vector<8x128xf32>
    %156 = vector.broadcast %154 : vector<1x128xf32> to vector<8x128xf32>
    %157 = arith.mulf %155, %156 : vector<8x128xf32>
    %158 = arith.addf %152, %157 : vector<8x128xf32>
    %159 = vector.extract_strided_slice %114 {offsets = [0, 7], sizes = [8, 1], strides = [1, 1]} : vector<8x128xf32> to vector<8x1xf32>
    %c25 = arith.constant 25 : index
    %c0_37 = arith.constant 0 : index
    %160 = vector.load %arg1[%c25, %c0_37] : memref<32x128xf32, #tpu.memory_space<vmem>>, vector<1x128xf32>
    %161 = vector.broadcast %159 : vector<8x1xf32> to vector<8x128xf32>
    %162 = vector.broadcast %160 : vector<1x128xf32> to vector<8x128xf32>
    %163 = arith.mulf %161, %162 : vector<8x128xf32>
    %164 = arith.addf %158, %163 : vector<8x128xf32>
    %165 = vector.extract_strided_slice %114 {offsets = [0, 8], sizes = [8, 1], strides = [1, 1]} : vector<8x128xf32> to vector<8x1xf32>
    %c26 = arith.constant 26 : index
    %c0_38 = arith.constant 0 : index
    %166 = vector.load %arg1[%c26, %c0_38] : memref<32x128xf32, #tpu.memory_space<vmem>>, vector<1x128xf32>
    %167 = vector.broadcast %165 : vector<8x1xf32> to vector<8x128xf32>
    %168 = vector.broadcast %166 : vector<1x128xf32> to vector<8x128xf32>
    %169 = arith.mulf %167, %168 : vector<8x128xf32>
    %170 = arith.addf %164, %169 : vector<8x128xf32>
    %171 = vector.extract_strided_slice %114 {offsets = [0, 9], sizes = [8, 1], strides = [1, 1]} : vector<8x128xf32> to vector<8x1xf32>
    %c27 = arith.constant 27 : index
    %c0_39 = arith.constant 0 : index
    %172 = vector.load %arg1[%c27, %c0_39] : memref<32x128xf32, #tpu.memory_space<vmem>>, vector<1x128xf32>
    %173 = vector.broadcast %171 : vector<8x1xf32> to vector<8x128xf32>
    %174 = vector.broadcast %172 : vector<1x128xf32> to vector<8x128xf32>
    %175 = arith.mulf %173, %174 : vector<8x128xf32>
    %176 = arith.addf %170, %175 : vector<8x128xf32>
    %cst_40 = arith.constant dense<0.000000e+00> : vector<128xf32>
    %177 = vector.multi_reduction <add>, %176, %cst_40 [0] : vector<8x128xf32> to vector<128xf32>
    %178 = vector.shape_cast %177 : vector<128xf32> to vector<1x128xf32>
    %cst_41 = arith.constant 1.250000e-01 : f32
    %179 = vector.broadcast %cst_41 : f32 to vector<1x128xf32>
    %180 = arith.mulf %178, %179 : vector<1x128xf32>
    %181 = arith.mulf %176, %176 : vector<8x128xf32>
    %cst_42 = arith.constant dense<0.000000e+00> : vector<128xf32>
    %182 = vector.multi_reduction <add>, %181, %cst_42 [0] : vector<8x128xf32> to vector<128xf32>
    %183 = vector.shape_cast %182 : vector<128xf32> to vector<1x128xf32>
    %cst_43 = arith.constant 1.250000e-01 : f32
    %184 = vector.broadcast %cst_43 : f32 to vector<1x128xf32>
    %185 = arith.mulf %183, %184 : vector<1x128xf32>
    %186 = arith.mulf %180, %180 : vector<1x128xf32>
    %187 = arith.subf %185, %186 : vector<1x128xf32>
    %cst_44 = arith.constant 9.99999974E-6 : f32
    %188 = vector.broadcast %cst_44 : f32 to vector<1x128xf32>
    %189 = arith.addf %187, %188 : vector<1x128xf32>
    %190 = math.rsqrt %189 : vector<1x128xf32>
    %191 = arith.mulf %7, %190 : vector<1x128xf32>
    %192 = arith.mulf %180, %191 : vector<1x128xf32>
    %193 = arith.subf %8, %192 : vector<1x128xf32>
    %194 = vector.broadcast %191 : vector<1x128xf32> to vector<8x128xf32>
    %195 = arith.mulf %176, %194 : vector<8x128xf32>
    %196 = vector.broadcast %193 : vector<1x128xf32> to vector<8x128xf32>
    %197 = arith.addf %195, %196 : vector<8x128xf32>
    %cst_45 = arith.constant 0.000000e+00 : f32
    %198 = vector.broadcast %cst_45 : f32 to vector<8x128xf32>
    %199 = arith.maximumf %197, %198 : vector<8x128xf32>
    %c0_46 = arith.constant 0 : index
    %c0_47 = arith.constant 0 : index
    %200 = vector.load %arg2[%c0_46, %c0_47] : memref<8x128xf32, #tpu.memory_space<vmem>>, vector<8x128xf32>
    tpu.vector_store %arg2[%c0_46, %c0_47], %199 {strides = array<i32>} : memref<8x128xf32, #tpu.memory_space<vmem>>, vector<8x128xf32>,
    return
  }
}

</mosaic_0001>

<bundles_post_ra>
// kernel: tpu_custom_call.1
= control target key start
LH: loop header
LB: loop body
LE: loop exit
PB: predicated region body
PF: predicated region fallthrough
CT: control target
= control target key end

     0   :  { %7 = vsyncpa [#allocation3], 0  ;;  %s626_s0 = inlined_call_operand.hbm [shape: f32[8,128], index: 0, kind: input, shape index: {}]   ;;  %s627_s1 = inlined_call_operand.hbm [shape: f32[32,128], index: 1, kind: input, shape index: {}]   ;;  %s628_s2 = inlined_call_operand.hbm [shape: f32[8,128], index: 2, kind: output, shape index: {}]  }
   0x1   :  { %8 = vsyncpa [#allocation6], 0 }
   0x2   :  { %9 = vsyncpa [#allocation4], 0  ;;  %s528_s9 = smov [#allocation2]   ;;  %s529_s11 = smov [#allocation5]  }
   0x3   :  { %s16_s10 = sshll.u32 %s528_s9, 4  ;;  %s25_s12 = sshll.u32 %s529_s11, 4  ;;  %s17_s10 = int_to_ptr.vmem [resolvable:$true] %s16_s10  ;;  %s558_s12 = int_to_ptr.vmem [resolvable:$true] %s25_s12 }
   0x4   :  { %s456_s15 = scalar_lea.hbm %s626_s0, 128 }
   0x5   :  { %p457_p0 = scmp.ne.s32.totalorder %s626_s0, %s456_s15  ;;  %p460_p1 = scmp.lt.u32.totalorder %s456_s15, %s626_s0 }
   0x7   :  { %p462_p2 = pnand %p460_p1, %p457_p0 }
   0x9   :  { %465 = shalt.err (!%p462_p2)
}
   0xa   :  { %s466_s20 = scalar_lea.vmem %s17_s10, 128  ;;  %p471_p4 = scmp.lt.s32.totalorder %s17_s10, %s17_s10 }
   0xb   :  { %p467_p3 = scmp.ne.s32.totalorder %s17_s10, %s466_s20  ;;  %p472_p5 = scmp.lt.s32.totalorder %s466_s20, %s466_s20 }
   0xd   :  { %p473_p6 = por %p472_p5, %p471_p4 }
   0xf   :  { %p474_p7 = pnand %p473_p6, %p467_p3 }
  0x11   :  { %477 = shalt.err (!%p474_p7)
}
  0x12   :  { %19 = dma.hbm_to_vmem [thread:$0]  %s626_s0, 128, %s17_s10, [#allocation3]  }
  0x13   :  { %s478_s25 = scalar_lea.hbm %s627_s1, 512 }
  0x14   :  { %p479_p8 = scmp.ne.s32.totalorder %s627_s1, %s478_s25  ;;  %p482_p9 = scmp.lt.u32.totalorder %s478_s25, %s627_s1 }
  0x16   :  { %p484_p10 = pnand %p482_p9, %p479_p8 }
  0x18   :  { %487 = shalt.err (!%p484_p10)
}
  0x19   :  { %s488_s30 = scalar_lea.vmem %s558_s12, 512  ;;  %p493_p12 = scmp.lt.s32.totalorder %s558_s12, %s558_s12 }
  0x1a   :  { %p489_p11 = scmp.ne.s32.totalorder %s558_s12, %s488_s30  ;;  %p494_p13 = scmp.lt.s32.totalorder %s488_s30, %s488_s30 }
  0x1c   :  { %p495_p0 = por %p494_p13, %p493_p12 }
  0x1e   :  { %p496_p1 = pnand %p495_p0, %p489_p11 }
  0x20   :  { %499 = shalt.err (!%p496_p1)
}
  0x21   :  { %s530_s0 = smov 128   ;;  %s531_s3 = smov 8  }
  0x22   :  { %31 = dma.hbm_to_vmem [thread:$0]  %s627_s1, 512, %s558_s12, [#allocation6], %s530_s0, %s530_s0, %s531_s3  }
  0x23   :  { %522 = dma.done.wait [#allocation3], 128  }
  0x24   :  { %523 = vsyncadd [#allocation3], 4294967168 }
  0x25   :  { %524 = dma.done.wait [#allocation6], 512  }
  0x26   :  { %525 = vsyncadd [#allocation6], 4294966784  ;;  %v532_v0 = vmov 2   ;;  %v533_v1 = vmov 0   ;;  %v38_v2 = vld [vmem:[#allocation2] sm:$0xff]  ;;  %v69_v21 = vlaneseq  ;;  %v534_v34 = vmov 3  }
  0x27   :  { %431 = vset.pattern.permute.xlu1 %v532_v0  ;;  %429 = vset.pattern.permute.xlu0 %v533_v1  ;;  %v47_v3 = vrot.slane %v38_v2, 4  ;;  %v54_v4 = vmul.f32 %v38_v2, %v38_v2  ;;  %v39_v23 = vld [vmem:[#allocation5] sm:$0x1]  ;;  %v40_v27 = vld [vmem:[#allocation5 + $0x1] sm:$0x1]  ;;  %v535_v35 = vmov 1  }
  0x28   :  { %v70_v22 = vshrl.u32 %v69_v21, 7  ;;  %v536_v36 = vmov 4   ;;  %v537_v37 = vmov 5   ;;  %v538_v38 = vmov 6   ;;  %v393_v42 = vld [vmem:[#allocation5 + $0x8] ss:$0 sm:$0xff] }
  0x29   :  { %v48_v5 = vadd.f32 %v47_v3, %v38_v2  ;;  %v55_v6 = vrot.slane %v54_v4, 4  ;;  %v539_v39 = vmov 8   ;;  %v540_v40 = vmov 7   ;;  %v392_v45 = vld [vmem:[#allocation5 + $0x2] ss:$0 sm:$0xff]  ;;  %s542_s1 = smov [#allocation7]  }
  0x2a   :  { %v590_v24 = vsub.s32 0, %v70_v22  ;;  %v541_v41 = vmov 9   ;;  %v394_v47 = vld [vmem:[#allocation5 + $0x9] ss:$0 sm:$0xff]  ;;  %v395_v49 = vld [vmem:[#allocation5 + $0xa] ss:$0 sm:$0xff] }
  0x2b   :  { %v49_v7 = vrot.slane %v48_v5, 2  ;;  %v56_v8 = vadd.f32 %v55_v6, %v54_v4  ;;  %v396_v53 = vld [vmem:[#allocation5 + $0xb] ss:$0 sm:$0xff]  ;;  %v397_v56 = vld [vmem:[#allocation5 + $0xc] ss:$0 sm:$0xff]  ;;  %s382_s6 = sshll.u32 %s542_s1, 4  ;;  %s383_s6 = int_to_ptr.vmem [resolvable:$true] %s382_s6 }
  0x2c   :  { %v398_v60 = vld [vmem:[#allocation5 + $0xd] ss:$0 sm:$0xff]  ;;  %v399_v3 = vld [vmem:[#allocation5 + $0xe] ss:$0 sm:$0xff]  ;;  %s500_s7 = scalar_lea.vmem %s383_s6, 128  ;;  %p505_p3 = scmp.lt.s32.totalorder %s383_s6, %s383_s6 }
  0x2d   :  { %v50_v9 = vadd.f32 %v49_v7, %v48_v5  ;;  %v57_v10 = vrot.slane %v56_v8, 2  ;;  %v400_v7 = vld [vmem:[#allocation5 + $0xf] ss:$0 sm:$0xff]  ;;  %p501_p2 = scmp.ne.s32.totalorder %s383_s6, %s500_s7  ;;  %p506_p4 = scmp.lt.s32.totalorder %s500_s7, %s500_s7 }
  0x2f   :  { %v51_v11 = vrot.slane %v50_v9, 1  ;;  %v58_v12 = vadd.f32 %v57_v10, %v56_v8  ;;  %v401_v8 = vld [vmem:[#allocation5 + $0x10] ss:$0 sm:$0xff]  ;;  %p507_p5 = por %p506_p4, %p505_p3 }
  0x31   :  { %v52_v13 = vadd.f32 %v51_v11, %v50_v9  ;;  %v59_v14 = vrot.slane %v58_v12, 1  ;;  %p508_p6 = pnand %p507_p5, %p501_p2 }
  0x33   :  { %v53_v15 = vmul.f32 0.125, %v52_v13  ;;  %v60_v16 = vadd.f32 %v59_v14, %v58_v12 }
  0x35   :  { %v61_v17 = vmul.f32 0.125, %v60_v16  ;;  %v62_v18 = vmul.f32 %v53_v15, %v53_v15 }
  0x37   :  { %v63_v19 = vsub.f32 %v61_v17, %v62_v18 }
  0x39   :  { %v64_v20 = vadd.f32 1e-05, %v63_v19 }
  0x3b   :  { %450 = vrsqrt.f32 %v64_v20 }
  0x45   :  { %v451_v25 = vpop.eup %450 }
  0x46   :  { %v66_v26 = vmul.f32 %v451_v25, %v39_v23 }
  0x48   :  { %v67_v28 = vmul.f32 %v66_v26, %v53_v15  ;;  %v72_v29 = vrot.slane %v66_v26, %v590_v24  ;;  %v402_v15 = vld [vmem:[#allocation5 + $0x11] ss:$0 sm:$0xff] }
  0x4a   :  { %v68_v30 = vsub.f32 %v40_v27, %v67_v28  ;;  %v73_v31 = vmul.f32 %v72_v29, %v38_v2 }
  0x4c   :  { %v77_v32 = vrot.slane %v68_v30, %v590_v24 }
  0x4e   :  { %v78_v33 = vadd.f32 %v77_v32, %v73_v31 }
  0x50   :  { %108 = vperm.xlu1 %431, %v78_v33   ;;  %86 = vperm.xlu0 %429, %v78_v33  }
  0x54   :  { %432 = vset.pattern.permute.xlu1 %v534_v34  ;;  %430 = vset.pattern.permute.xlu0 %v535_v35 }
  0x55   :  { %119 = vperm.xlu1 %432, %v78_v33   ;;  %97 = vperm.xlu0 %430, %v78_v33  }
  0x59   :  { %433 = vset.pattern.permute.xlu1 %v536_v36  ;;  %434 = vset.pattern.permute.xlu0 %v537_v37 }
  0x5a   :  { %130 = vperm.xlu1 %433, %v78_v33   ;;  %141 = vperm.xlu0 %434, %v78_v33  }
  0x5e   :  { %435 = vset.pattern.permute.xlu1 %v538_v38  ;;  %437 = vset.pattern.permute.xlu0 %v539_v39 }
  0x5f   :  { %152 = vperm.xlu1 %435, %v78_v33   ;;  %174 = vperm.xlu0 %437, %v78_v33  }
  0x63   :  { %436 = vset.pattern.permute.xlu1 %v540_v40  ;;  %440 = vset.pattern.permute.xlu0 %v535_v35 }
  0x64   :  { %163 = vperm.xlu1 %436, %v78_v33  }
  0x68   :  { %438 = vset.pattern.permute.xlu1 %v541_v41 }
  0x69   :  { %185 = vperm.xlu1 %438, %v78_v33  }
  0x6d   :  { %439 = vset.pattern.permute.xlu1 %v533_v1 }
  0xcf   :  { %v109_v43 = vpop.permute.xlu1 %108  ;;  %v87_v44 = vpop.permute.xlu0 %86 }
  0xd0   :  { %v93_v46 = vmul.f32 %v393_v42, %v87_v44  ;;  %v115_v54 = vmul.f32 %v395_v49, %v109_v43  ;;  %v43_v49 = vld [vmem:[#allocation5 + $0x4] sm:$0x1] }
  0xd2   :  { %v94_v48 = vadd.f32 %v392_v45, %v93_v46  ;;  %v42_v46 = vld [vmem:[#allocation5 + $0x3] sm:$0x1] }
  0xd4   :  { %v120_v50 = vpop.permute.xlu1 %119  ;;  %v98_v51 = vpop.permute.xlu0 %97 }
  0xd5   :  { %v104_v52 = vmul.f32 %v394_v47, %v98_v51  ;;  %v126_v57 = vmul.f32 %v396_v53, %v120_v50 }
  0xd7   :  { %v105_v55 = vadd.f32 %v104_v52, %v94_v48 }
  0xd9   :  { %v116_v58 = vadd.f32 %v115_v54, %v105_v55  ;;  %v131_v59 = vpop.permute.xlu1 %130  ;;  %v142_v61 = vpop.permute.xlu0 %141 }
  0xda   :  { %v137_v62 = vmul.f32 %v397_v56, %v131_v59  ;;  %v148_v1 = vmul.f32 %v398_v60, %v142_v61 }
  0xdb   :  { %v127_v63 = vadd.f32 %v126_v57, %v116_v58  ;;  %v405_v57 = vld [vmem:[#allocation5 + $0x13] ss:$0 sm:$0xff] }
  0xdd   :  { %v138_v2 = vadd.f32 %v137_v62, %v127_v63 }
  0xde   :  { %v153_v4 = vpop.permute.xlu1 %152  ;;  %v175_v9 = vpop.permute.xlu0 %174 }
  0xdf   :  { %v149_v5 = vadd.f32 %v148_v1, %v138_v2  ;;  %v159_v6 = vmul.f32 %v399_v3, %v153_v4  ;;  %v181_v13 = vmul.f32 %v401_v8, %v175_v9  ;;  %v408_v3 = vld [vmem:[#allocation5 + $0x16] ss:$0 sm:$0xff] }
  0xe1   :  { %v160_v11 = vadd.f32 %v159_v6, %v149_v5  ;;  %v409_v5 = vld [vmem:[#allocation5 + $0x17] ss:$0 sm:$0xff] }
  0xe3   :  { %v164_v10 = vpop.permute.xlu1 %163 }
  0xe4   :  { %v170_v12 = vmul.f32 %v400_v7, %v164_v10  ;;  %v410_v10 = vld [vmem:[#allocation5 + $0x18] ss:$0 sm:$0xff] }
  0xe6   :  { %v171_v14 = vadd.f32 %v170_v12, %v160_v11 }
  0xe8   :  { %v182_v16 = vadd.f32 %v181_v13, %v171_v14  ;;  %v186_v17 = vpop.permute.xlu1 %185  ;;  %v411_v14 = vld [vmem:[#allocation5 + $0x19] ss:$0 sm:$0xff] }
  0xe9   :  { %v192_v18 = vmul.f32 %v402_v15, %v186_v17  ;;  %v412_v17 = vld [vmem:[#allocation5 + $0x1a] ss:$0 sm:$0xff] }
  0xeb   :  { %v193_v19 = vadd.f32 %v192_v18, %v182_v16 }
  0xed   :  { %v194_v20 = vrot.slane %v193_v19, 4  ;;  %v201_v21 = vmul.f32 %v193_v19, %v193_v19 }
  0xef   :  { %v195_v22 = vadd.f32 %v194_v20, %v193_v19  ;;  %v202_v23 = vrot.slane %v201_v21, 4 }
  0xf1   :  { %v196_v25 = vrot.slane %v195_v22, 2  ;;  %v203_v26 = vadd.f32 %v202_v23, %v201_v21 }
  0xf3   :  { %v197_v27 = vadd.f32 %v196_v25, %v195_v22  ;;  %v204_v28 = vrot.slane %v203_v26, 2  ;;  %v413_v22 = vld [vmem:[#allocation5 + $0x1b] ss:$0 sm:$0xff] }
  0xf5   :  { %v198_v29 = vrot.slane %v197_v27, 1  ;;  %v205_v30 = vadd.f32 %v204_v28, %v203_v26 }
  0xf7   :  { %v199_v31 = vadd.f32 %v198_v29, %v197_v27  ;;  %v206_v32 = vrot.slane %v205_v30, 1 }
  0xf9   :  { %v200_v33 = vmul.f32 0.125, %v199_v31  ;;  %v207_v35 = vadd.f32 %v206_v32, %v205_v30 }
  0xfb   :  { %v208_v42 = vmul.f32 0.125, %v207_v35  ;;  %v209_v43 = vmul.f32 %v200_v33, %v200_v33 }
  0xfd   :  { %v210_v44 = vsub.f32 %v208_v42, %v209_v43 }
  0xff   :  { %v211_v45 = vadd.f32 1e-05, %v210_v44 }
 0x101   :  { %452 = vrsqrt.f32 %v211_v45 }
 0x10b   :  { %v453_v47 = vpop.eup %452 }
 0x10c   :  { %v213_v48 = vmul.f32 %v453_v47, %v42_v46 }
 0x10e   :  { %v214_v50 = vmul.f32 %v213_v48, %v200_v33  ;;  %v219_v51 = vrot.slane %v213_v48, %v590_v24 }
 0x110   :  { %v215_v52 = vsub.f32 %v43_v49, %v214_v50  ;;  %v220_v53 = vmul.f32 %v219_v51, %v193_v19 }
 0x112   :  { %v224_v54 = vrot.slane %v215_v52, %v590_v24 }
 0x114   :  { %v225_v55 = vadd.f32 %v224_v54, %v220_v53  ;;  %v45_v53 = vld [vmem:[#allocation5 + $0x6] sm:$0x1] }
 0x116   :  { %v226_v56 = vmax.f32 %v225_v55, 0.0 }
 0x118   :  { %245 = vperm.xlu0 %440, %v226_v56   ;;  %234 = vperm.xlu1 %439, %v226_v56  }
 0x11c   :  { %443 = vset.pattern.permute.xlu0 %v536_v36  ;;  %441 = vset.pattern.permute.xlu1 %v532_v0  ;;  %v404_v0 = vld [vmem:[#allocation5 + $0x12] ss:$0 sm:$0xff]  ;;  %v403_v36 = vld [vmem:[#allocation5 + $0x5] ss:$0 sm:$0xff] }
 0x11d   :  { %278 = vperm.xlu0 %443, %v226_v56   ;;  %256 = vperm.xlu1 %441, %v226_v56  }
 0x121   :  { %446 = vset.pattern.permute.xlu0 %v540_v40  ;;  %442 = vset.pattern.permute.xlu1 %v534_v34 }
 0x122   :  { %311 = vperm.xlu0 %446, %v226_v56   ;;  %267 = vperm.xlu1 %442, %v226_v56  }
 0x126   :  { %444 = vset.pattern.permute.xlu1 %v537_v37  ;;  %449 = vset.pattern.permute.xlu0 %v541_v41  ;;  %v406_v37 = vld [vmem:[#allocation5 + $0x14] ss:$0 sm:$0xff] }
 0x127   :  { %289 = vperm.xlu1 %444, %v226_v56  }
 0x12b   :  { %445 = vset.pattern.permute.xlu1 %v538_v38  ;;  %v407_v38 = vld [vmem:[#allocation5 + $0x15] ss:$0 sm:$0xff] }
 0x12c   :  { %300 = vperm.xlu1 %445, %v226_v56  }
 0x130   :  { %447 = vset.pattern.permute.xlu1 %v539_v39 }
 0x131   :  { %322 = vperm.xlu1 %447, %v226_v56  }
 0x135   :  { %448 = vset.pattern.permute.xlu1 %v541_v41 }
 0x136   :  { %333 = vperm.xlu1 %448, %v226_v56   ;;  %v46_v56 = vld [vmem:[#allocation5 + $0x7] sm:$0x1] }
 0x197   :  { %v235_v40 = vpop.permute.xlu1 %234  ;;  %v246_v58 = vpop.permute.xlu0 %245 }
 0x198   :  { %v241_v34 = vmul.f32 %v404_v0, %v235_v40  ;;  %v252_v60 = vmul.f32 %v405_v57, %v246_v58 }
 0x19a   :  { %v242_v59 = vadd.f32 %v403_v36, %v241_v34 }
 0x19c   :  { %v257_v61 = vpop.permute.xlu1 %256  ;;  %v253_v62 = vadd.f32 %v252_v60, %v242_v59  ;;  %v279_v4 = vpop.permute.xlu0 %278 }
 0x19d   :  { %v263_v63 = vmul.f32 %v406_v37, %v257_v61  ;;  %v285_v6 = vmul.f32 %v408_v3, %v279_v4 }
 0x19f   :  { %v264_v2 = vadd.f32 %v263_v63, %v253_v62 }
 0x1a1   :  { %v268_v1 = vpop.permute.xlu1 %267  ;;  %v312_v15 = vpop.permute.xlu0 %311 }
 0x1a2   :  { %v274_v39 = vmul.f32 %v407_v38, %v268_v1  ;;  %v318_v18 = vmul.f32 %v411_v14, %v312_v15 }
 0x1a4   :  { %v275_v41 = vadd.f32 %v274_v39, %v264_v2 }
 0x1a6   :  { %v290_v7 = vpop.permute.xlu1 %289  ;;  %v286_v8 = vadd.f32 %v285_v6, %v275_v41 }
 0x1a7   :  { %v296_v9 = vmul.f32 %v409_v5, %v290_v7 }
 0x1a9   :  { %v297_v12 = vadd.f32 %v296_v9, %v286_v8 }
 0x1ab   :  { %v301_v11 = vpop.permute.xlu1 %300 }
 0x1ac   :  { %v307_v13 = vmul.f32 %v410_v10, %v301_v11 }
 0x1ae   :  { %v308_v16 = vadd.f32 %v307_v13, %v297_v12 }
 0x1b0   :  { %v323_v19 = vpop.permute.xlu1 %322  ;;  %v319_v20 = vadd.f32 %v318_v18, %v308_v16 }
 0x1b1   :  { %v329_v21 = vmul.f32 %v412_v17, %v323_v19 }
 0x1b3   :  { %v330_v25 = vadd.f32 %v329_v21, %v319_v20 }
 0x1b5   :  { %v334_v23 = vpop.permute.xlu1 %333 }
 0x1b6   :  { %v340_v26 = vmul.f32 %v413_v22, %v334_v23 }
 0x1b8   :  { %v341_v27 = vadd.f32 %v340_v26, %v330_v25 }
 0x1ba   :  { %v342_v28 = vrot.slane %v341_v27, 4  ;;  %v349_v29 = vmul.f32 %v341_v27, %v341_v27 }
 0x1bc   :  { %v343_v30 = vadd.f32 %v342_v28, %v341_v27  ;;  %v350_v31 = vrot.slane %v349_v29, 4 }
 0x1be   :  { %v344_v32 = vrot.slane %v343_v30, 2  ;;  %v351_v33 = vadd.f32 %v350_v31, %v349_v29 }
 0x1c0   :  { %v345_v35 = vadd.f32 %v344_v32, %v343_v30  ;;  %v352_v42 = vrot.slane %v351_v33, 2 }
 0x1c2   :  { %v346_v43 = vrot.slane %v345_v35, 1  ;;  %v353_v44 = vadd.f32 %v352_v42, %v351_v33 }
 0x1c4   :  { %v354_v45 = vrot.slane %v353_v44, 1  ;;  %v347_v46 = vadd.f32 %v346_v43, %v345_v35 }
 0x1c6   :  { %v355_v47 = vadd.f32 %v354_v45, %v353_v44  ;;  %v348_v48 = vmul.f32 0.125, %v347_v46 }
 0x1c8   :  { %v356_v49 = vmul.f32 0.125, %v355_v47  ;;  %v357_v50 = vmul.f32 %v348_v48, %v348_v48 }
 0x1ca   :  { %v358_v51 = vsub.f32 %v356_v49, %v357_v50 }
 0x1cc   :  { %v359_v52 = vadd.f32 1e-05, %v358_v51 }
 0x1ce   :  { %454 = vrsqrt.f32 %v359_v52 }
 0x1d8   :  { %v455_v54 = vpop.eup %454 }
 0x1d9   :  { %v361_v55 = vmul.f32 %v455_v54, %v45_v53 }
 0x1db   :  { %v362_v0 = vmul.f32 %v361_v55, %v348_v48  ;;  %v367_v36 = vrot.slane %v361_v55, %v590_v24 }
 0x1dd   :  { %v363_v40 = vsub.f32 %v46_v56, %v362_v0  ;;  %v368_v34 = vmul.f32 %v367_v36, %v341_v27 }
 0x1df   :  { %v372_v57 = vrot.slane %v363_v40, %v590_v24 }
 0x1e1   :  { %v373_v58 = vadd.f32 %v372_v57, %v368_v34 }
 0x1e3   :  { %v374_v59 = vmax.f32 %v373_v58, 0.0 }
 0x1e5   :  { %375 = vst [vmem:[#allocation7] sm:$0xff] %v374_v59 }
 0x1e6   :  { %511 = shalt.err (!%p508_p6)
}
 0x1e7   :  { %s512_s10 = scalar_lea.hbm %s628_s2, 128 }
 0x1e8   :  { %p513_p7 = scmp.ne.s32.totalorder %s628_s2, %s512_s10  ;;  %p516_p8 = scmp.lt.u32.totalorder %s512_s10, %s628_s2 }
 0x1ea   :  { %p518_p9 = pnand %p516_p8, %p513_p7 }
 0x1ec   :  { %521 = shalt.err (!%p518_p9)
}
 0x1ed   :  { %385 = dma.vmem_to_hbm [thread:$0]  %s383_s6, 128, %s628_s2, [#allocation4]  }
 0x1ee   :  { %526 = dma.done.wait [#allocation4], 128  }
 0x1ef   :  { %527 = vsyncadd [#allocation4], 4294967168 }
 0x1f0   :  { %389 = vsyncpa [#allocation3], 1 }
 0x1f1   :  { %390 = vsyncpa [#allocation6], 1 }
 0x1f2   :  { %391 = vsyncpa [#allocation4], 1 }

</bundles_post_ra>
